<compile_context>
chip_gen: v6e
topology: v6e:2x2x1
jax: 0.10.0
libtpu: 0.0.40
codegen_flags: <defaults>
</compile_context>

<pallas_src>
import numpy as np
import jax
import jax.numpy as jnp
from jax.experimental import pallas as pl
from jax.experimental.pallas import tpu as pltpu

EMBED_SIZE = 2
NUM_NEG_SAMPLES = 5
BATCH = 8                         # lanes per relation group (packing assumes BATCH == 8;
                                  # smaller batches would pad lanes with mask = 0)
NUM_RELATIONS = 10
NUM_CHANNELS = 32                 # 8 scalar + 8 (n0) + 8 (n1) + 8 (maskT), all 8-aligned
NLANES = NUM_RELATIONS * BATCH    # 80 -> 320 B contiguous HBM rows, 80/128 live lanes

ENTITY_VOCABS = dict(
    user=7, article=9, word=11, related_article=6,
    topic=5, product=8, topic_tag=4, product_tag=3,
)

# (relation_name, tail_entity) in module order
RELATIONS = [
    ("response", "article"),
    ("recommended", "article"),
    ("within", "word"),
    ("has_topic", "topic"),
    ("has_product", "product"),
    ("has_topic_tag", "topic_tag"),
    ("has_product_tag", "product_tag"),
    ("also_response", "related_article"),
    ("recommended_together", "related_article"),
    ("response_together", "related_article"),
]

# (head_entity, relation, tail_entity, head_col, tail_col) -- exactly compute_loss order
TRIPLES = [
    ("user", "response", "article", 0, 1),
    ("user", "recommended", "article", 0, 1),
    ("article", "within", "word", 1, 2),
    ("article", "has_topic", "topic", 1, 4),
    ("article", "has_product", "product", 1, 3),
    ("article", "has_topic_tag", "topic_tag", 1, 5),
    ("article", "has_product_tag", "product_tag", 1, 6),
    ("article", "also_response", "related_article", 1, 7),
    ("article", "recommended_together", "related_article", 1, 8),
    ("article", "response_together", "related_article", 1, 9),
]

COL_ENTITY = ["user", "article", "word", "product", "topic",
              "topic_tag", "product_tag", "related_article",
              "related_article", "related_article"]


def _softplus(x):
    # numerically stable log(1 + exp(x)) == -log(sigmoid(-x)); never overflows.
    # (jnp.log(1 + t), t in (0,1], is within a few ULP of log1p -- fine at rtol=1e-4.)
    return jnp.maximum(x, 0.0) + jnp.log(1.0 + jnp.exp(-jnp.abs(x)))


def kg_loss_kernel(packed_ref, out_ref):
    S = NUM_NEG_SAMPLES
    # Scalar channels: single tile-row (1, NLANES) views, 80/128 lanes live.
    h0 = packed_ref[0:1, :]
    h1 = packed_ref[1:2, :]
    t0 = packed_ref[2:3, :]
    t1 = packed_ref[3:4, :]
    r0 = packed_ref[4:5, :]
    r1 = packed_ref[5:6, :]
    bias = packed_ref[6:7, :]
    mask = packed_ref[7:8, :]
    # 8-aligned channel groups: whole-sublane-tile views (no relayout).
    n0 = packed_ref[8:16, :]       # [8, NLANES]  rows 0..S-1 real, rest zero pad
    n1 = packed_ref[16:24, :]      # [8, NLANES]
    mT = packed_ref[24:32, :]      # [8, NLANES]  row b = mask(r, b) over relation r's lanes

    # example_vec = head + relation_vec; E=2 kept as two planes -> pure VALU (no MXU).
    ex0 = h0 + r0
    ex1 = h1 + r1

    # positive: <tail, example> + bias ; -log(sigmoid(x)) = softplus(-x)
    pos_loss = _softplus(-(ex0 * t0 + ex1 * t1 + bias))          # [1, NLANES]

    # negatives, all samples at once via sublane broadcast; rows >= S are padding.
    neg_logits = ex0 * n0 + ex1 * n1 + bias                      # [8, NLANES]
    srow = jax.lax.broadcasted_iota(jnp.int32, (8, NLANES), 0)
    neg_terms = jnp.where(srow < S, _softplus(neg_logits), 0.0)
    neg_loss = jnp.sum(neg_terms, axis=0, keepdims=True)         # [1, NLANES]

    # per-relation masked mean: count broadcast to every lane of its relation group
    # comes from a plain sublane reduce of the transposed-mask channel group.
    cnt = jnp.sum(mT, axis=0, keepdims=True)                     # [1, NLANES]
    rel_scale = jnp.where(cnt > 0.0, 1.0 / jnp.maximum(cnt, 1.0), 0.0)

    # single weighted full reduce -> scalar in SMEM
    out_ref[0, 0] = jnp.sum((pos_loss + neg_loss) * mask * rel_scale)


def kg_total_loss(packed):
    out = pl.pallas_call(
        kg_loss_kernel,
        out_shape=jax.ShapeDtypeStruct((1, 1), jnp.float32),
        in_specs=[pl.BlockSpec(memory_space=pltpu.MemorySpace.VMEM)],
        out_specs=pl.BlockSpec(memory_space=pltpu.MemorySpace.SMEM),
    )(packed)
    return out[0, 0]


def init_params(key):
    """Deterministic parameter init mirroring KnowledgeEmbedding.__init__."""
    params = {"entity": {}, "rel_vec": {}, "rel_bias": {}, "distrib": {}}
    initrange = 0.5 / EMBED_SIZE
    keys = jax.random.split(key, 8 + 2 * len(RELATIONS))
    ki = 0
    for name, vs in ENTITY_VOCABS.items():
        # entity embedding [vocab+1, E], uniform(-initrange, initrange)
        params["entity"][name] = jax.random.uniform(
            keys[ki], (vs + 1, EMBED_SIZE), jnp.float32, -initrange, initrange)
        ki += 1
    for rel, tail in RELATIONS:
        params["rel_vec"][rel] = jax.random.uniform(
            keys[ki], (1, EMBED_SIZE), jnp.float32, -initrange, initrange)
        ki += 1
        tail_vs = ENTITY_VOCABS[tail]
        # relation bias embedding [vocab+1, 1], zeros (as in _relation_bias)
        params["rel_bias"][rel] = jnp.zeros((tail_vs + 1, 1), jnp.float32)
        # _make_distrib: positive vector ** 0.75, normalized
        raw = jax.random.uniform(keys[ki], (tail_vs,), jnp.float32, 0.1, 1.0)
        ki += 1
        d = raw ** 0.75
        params["distrib"][rel] = d / d.sum()
    return params


def build_packed_inputs(params, batch_idxs, sample_key):
    """Host-side glue: embedding/bias gathers + negative sampling, packed into one
    channel-major [C=32, R*B=80] slab (lane = relation*8 + batch)."""
    assert batch_idxs.shape[0] == BATCH, "packing assumes BATCH lanes per relation group"
    skeys = jax.random.split(sample_key, len(TRIPLES))
    B = BATCH
    blocks = []
    for i, (he, rel, te, hcol, tcol) in enumerate(TRIPLES):
        h_idx = batch_idxs[:, hcol]
        t_idx = batch_idxs[:, tcol]
        mask = (t_idx >= 0)
        h_safe = jnp.where(mask, h_idx, 0)
        t_safe = jnp.where(mask, t_idx, 0)
        head_tab = params["entity"][he]
        tail_tab = params["entity"][te]
        h = head_tab[h_safe]                                            # [B, E]
        t = tail_tab[t_safe]                                            # [B, E]
        rv = jnp.broadcast_to(params["rel_vec"][rel], (B, EMBED_SIZE))  # [B, E]
        bias = params["rel_bias"][rel][t_safe, 0]                       # [B]
        m = mask.astype(jnp.float32)                                    # [B]
        distrib = params["distrib"][rel]
        # TODO(synk): torch.multinomial RNG stream not reproducible in JAX; semantics-
        # equivalent sampling (with replacement, prob proportional to distrib) via choice.
        neg_idx = jax.random.choice(
            skeys[i], distrib.shape[0], shape=(NUM_NEG_SAMPLES,), replace=True, p=distrib)
        neg = tail_tab[neg_idx]                                         # [S, E]
        zpad = jnp.zeros((8 - NUM_NEG_SAMPLES, B), jnp.float32)
        n0 = jnp.concatenate(
            [jnp.broadcast_to(neg[:, 0][:, None], (NUM_NEG_SAMPLES, B)), zpad], axis=0)
        n1 = jnp.concatenate(
            [jnp.broadcast_to(neg[:, 1][:, None], (NUM_NEG_SAMPLES, B)), zpad], axis=0)
        # transposed mask group: row b holds mask[b] in all 8 lanes of this relation
        mT = jnp.broadcast_to(m[:, None], (B, B))                       # [8, 8]
        block = jnp.concatenate([
            h[:, 0][None, :], h[:, 1][None, :],
            t[:, 0][None, :], t[:, 1][None, :],
            rv[:, 0][None, :], rv[:, 1][None, :],
            bias[None, :], m[None, :],
            n0, n1, mT,
        ], axis=0)                                                      # [32, B]
        blocks.append(block)
    packed = jnp.stack(blocks, axis=1)                                  # [C, R, B]
    return packed.reshape(NUM_CHANNELS, NUM_RELATIONS * B).astype(jnp.float32)


def reference_loss(packed):
    """Pure-JAX reference of the same math on the packed slab (correctness check)."""
    S = NUM_NEG_SAMPLES
    p = packed.reshape(NUM_CHANNELS, NUM_RELATIONS, BATCH)
    h0, h1, t0, t1, r0, r1, bias, mask = [p[c] for c in range(8)]       # each [R, B]
    n0 = p[8:8 + S]                                                     # [S, R, B]
    n1 = p[16:16 + S]
    ex0, ex1 = h0 + r0, h1 + r1
    pos_logits = ex0 * t0 + ex1 * t1 + bias
    pos_loss = -jnp.log(jax.nn.sigmoid(pos_logits))
    neg_logits = ex0[None] * n0 + ex1[None] * n1 + bias[None]
    neg_loss = jnp.sum(-jnp.log(jax.nn.sigmoid(-neg_logits)), axis=0)   # [R, B]
    per = (pos_loss + neg_loss) * mask
    cnt = mask.sum(-1)                                                  # [R]
    rel_loss = jnp.where(cnt > 0, per.sum(-1) / jnp.maximum(cnt, 1.0), 0.0)
    return rel_loss.sum()


if __name__ == "__main__":
    root = jax.random.PRNGKey(0)
    k_params, k_batch, k_samples = jax.random.split(root, 3)

    params = init_params(k_params)

    # batch_idxs: [B, 10] = (u, article, word, product, topic, topic_tag,
    #                        product_tag, rarticle1, rarticle2, rarticle3)
    bkeys = jax.random.split(k_batch, len(COL_ENTITY))
    cols = [jax.random.randint(bkeys[j], (BATCH,), 0, ENTITY_VOCABS[ent])
            for j, ent in enumerate(COL_ENTITY)]
    batch_idxs = jnp.stack(cols, axis=1).astype(jnp.int32)
    batch_idxs = batch_idxs.at[0, 7].set(-1)   # exercise the tail_idx >= 0 mask

    packed = build_packed_inputs(params, batch_idxs, k_samples)   # [32, 80]

    loss = jax.block_until_ready(kg_total_loss(packed))
    ref = jax.block_until_ready(reference_loss(packed))
    np.testing.assert_allclose(np.asarray(loss), np.asarray(ref), rtol=1e-4, atol=1e-5)

    print("KERNEL_OK")
</pallas_src>

<mosaic_0001>
module attributes {stable_mosaic.version = 11 : i64} {
  func.func @kg_loss_kernel(%arg0: memref<32x80xf32, #tpu.memory_space<vmem>>, %arg1: memref<1x1xf32, #tpu.memory_space<smem>>) attributes {dimension_semantics = [], scalar_prefetch = 0 : i64, scratch_operands = 0 : i64, tpu.core_type = #tpu.core_type<tc>} {
    %c0 = arith.constant 0 : index
    %c0_0 = arith.constant 0 : index
    %0 = vector.load %arg0[%c0, %c0_0] : memref<32x80xf32, #tpu.memory_space<vmem>>, vector<1x80xf32>
    %c1 = arith.constant 1 : index
    %c0_1 = arith.constant 0 : index
    %1 = vector.load %arg0[%c1, %c0_1] : memref<32x80xf32, #tpu.memory_space<vmem>>, vector<1x80xf32>
    %c2 = arith.constant 2 : index
    %c0_2 = arith.constant 0 : index
    %2 = vector.load %arg0[%c2, %c0_2] : memref<32x80xf32, #tpu.memory_space<vmem>>, vector<1x80xf32>
    %c3 = arith.constant 3 : index
    %c0_3 = arith.constant 0 : index
    %3 = vector.load %arg0[%c3, %c0_3] : memref<32x80xf32, #tpu.memory_space<vmem>>, vector<1x80xf32>
    %c4 = arith.constant 4 : index
    %c0_4 = arith.constant 0 : index
    %4 = vector.load %arg0[%c4, %c0_4] : memref<32x80xf32, #tpu.memory_space<vmem>>, vector<1x80xf32>
    %c5 = arith.constant 5 : index
    %c0_5 = arith.constant 0 : index
    %5 = vector.load %arg0[%c5, %c0_5] : memref<32x80xf32, #tpu.memory_space<vmem>>, vector<1x80xf32>
    %c6 = arith.constant 6 : index
    %c0_6 = arith.constant 0 : index
    %6 = vector.load %arg0[%c6, %c0_6] : memref<32x80xf32, #tpu.memory_space<vmem>>, vector<1x80xf32>
    %c7 = arith.constant 7 : index
    %c0_7 = arith.constant 0 : index
    %7 = vector.load %arg0[%c7, %c0_7] : memref<32x80xf32, #tpu.memory_space<vmem>>, vector<1x80xf32>
    %c8 = arith.constant 8 : index
    %c0_8 = arith.constant 0 : index
    %8 = vector.load %arg0[%c8, %c0_8] : memref<32x80xf32, #tpu.memory_space<vmem>>, vector<8x80xf32>
    %c16 = arith.constant 16 : index
    %c0_9 = arith.constant 0 : index
    %9 = vector.load %arg0[%c16, %c0_9] : memref<32x80xf32, #tpu.memory_space<vmem>>, vector<8x80xf32>
    %c24 = arith.constant 24 : index
    %c0_10 = arith.constant 0 : index
    %10 = vector.load %arg0[%c24, %c0_10] : memref<32x80xf32, #tpu.memory_space<vmem>>, vector<8x80xf32>
    %11 = arith.addf %0, %4 : vector<1x80xf32>
    %12 = arith.addf %1, %5 : vector<1x80xf32>
    %13 = arith.mulf %11, %2 : vector<1x80xf32>
    %14 = arith.mulf %12, %3 : vector<1x80xf32>
    %15 = arith.addf %13, %14 : vector<1x80xf32>
    %16 = arith.addf %15, %6 : vector<1x80xf32>
    %cst = arith.constant 0.000000e+00 : f32
    %17 = vector.broadcast %cst : f32 to vector<1x80xf32>
    %18 = arith.subf %17, %16 : vector<1x80xf32>
    %cst_11 = arith.constant 0.000000e+00 : f32
    %19 = vector.broadcast %cst_11 : f32 to vector<1x80xf32>
    %20 = arith.maximumf %18, %19 : vector<1x80xf32>
    %21 = math.absf %18 : vector<1x80xf32>
    %cst_12 = arith.constant 0.000000e+00 : f32
    %22 = vector.broadcast %cst_12 : f32 to vector<1x80xf32>
    %23 = arith.subf %22, %21 : vector<1x80xf32>
    %24 = math.exp %23 : vector<1x80xf32>
    %cst_13 = arith.constant 1.000000e+00 : f32
    %25 = vector.broadcast %cst_13 : f32 to vector<1x80xf32>
    %26 = arith.addf %25, %24 : vector<1x80xf32>
    %27 = math.log %26 : vector<1x80xf32>
    %28 = arith.addf %20, %27 : vector<1x80xf32>
    %29 = vector.broadcast %11 : vector<1x80xf32> to vector<8x80xf32>
    %30 = arith.mulf %29, %8 : vector<8x80xf32>
    %31 = vector.broadcast %12 : vector<1x80xf32> to vector<8x80xf32>
    %32 = arith.mulf %31, %9 : vector<8x80xf32>
    %33 = arith.addf %30, %32 : vector<8x80xf32>
    %34 = vector.broadcast %6 : vector<1x80xf32> to vector<8x80xf32>
    %35 = arith.addf %33, %34 : vector<8x80xf32>
    %36 = tpu.iota {dimensions = array<i32: 0>} : vector<8x80xi32>
    %c5_i32 = arith.constant 5 : i32
    %37 = vector.broadcast %c5_i32 : i32 to vector<8x80xi32>
    %38 = arith.cmpi slt, %36, %37 : vector<8x80xi32>
    %cst_14 = arith.constant 0.000000e+00 : f32
    %39 = vector.broadcast %cst_14 : f32 to vector<8x80xf32>
    %40 = arith.maximumf %35, %39 : vector<8x80xf32>
    %41 = math.absf %35 : vector<8x80xf32>
    %cst_15 = arith.constant 0.000000e+00 : f32
    %42 = vector.broadcast %cst_15 : f32 to vector<8x80xf32>
    %43 = arith.subf %42, %41 : vector<8x80xf32>
    %44 = math.exp %43 : vector<8x80xf32>
    %cst_16 = arith.constant 1.000000e+00 : f32
    %45 = vector.broadcast %cst_16 : f32 to vector<8x80xf32>
    %46 = arith.addf %45, %44 : vector<8x80xf32>
    %47 = math.log %46 : vector<8x80xf32>
    %48 = arith.addf %40, %47 : vector<8x80xf32>
    %cst_17 = arith.constant 0.000000e+00 : f32
    %49 = vector.broadcast %cst_17 : f32 to vector<8x80xf32>
    %50 = arith.select %38, %48, %49 : vector<8x80xi1>, vector<8x80xf32>
    %cst_18 = arith.constant dense<0.000000e+00> : vector<80xf32>
    %51 = vector.multi_reduction <add>, %50, %cst_18 [0] : vector<8x80xf32> to vector<80xf32>
    %52 = vector.shape_cast %51 : vector<80xf32> to vector<1x80xf32>
    %cst_19 = arith.constant dense<0.000000e+00> : vector<80xf32>
    %53 = vector.multi_reduction <add>, %10, %cst_19 [0] : vector<8x80xf32> to vector<80xf32>
    %54 = vector.shape_cast %53 : vector<80xf32> to vector<1x80xf32>
    %cst_20 = arith.constant 0.000000e+00 : f32
    %55 = vector.broadcast %cst_20 : f32 to vector<1x80xf32>
    %56 = arith.cmpf ogt, %54, %55 : vector<1x80xf32>
    %cst_21 = arith.constant 1.000000e+00 : f32
    %57 = vector.broadcast %cst_21 : f32 to vector<1x80xf32>
    %58 = arith.maximumf %54, %57 : vector<1x80xf32>
    %cst_22 = arith.constant 1.000000e+00 : f32
    %59 = vector.broadcast %cst_22 : f32 to vector<1x80xf32>
    %60 = arith.divf %59, %58 : vector<1x80xf32>
    %cst_23 = arith.constant 0.000000e+00 : f32
    %61 = vector.broadcast %cst_23 : f32 to vector<1x80xf32>
    %62 = arith.select %56, %60, %61 : vector<1x80xi1>, vector<1x80xf32>
    %63 = arith.addf %28, %52 : vector<1x80xf32>
    %64 = arith.mulf %63, %7 : vector<1x80xf32>
    %65 = arith.mulf %64, %62 : vector<1x80xf32>
    %66 = vector.shape_cast %65 : vector<1x80xf32> to vector<1x1x80xf32>
    %cst_24 = arith.constant dense<0.000000e+00> : vector<1xf32>
    %67 = vector.multi_reduction <add>, %66, %cst_24 [1, 2] : vector<1x1x80xf32> to vector<1xf32>
    %68 = vector.shape_cast %67 : vector<1xf32> to vector<1x1x1xf32>
    %69 = vector.extract %68[0, 0, 0] : f32 from vector<1x1x1xf32>
    %c0_25 = arith.constant 0 : index
    %c0_26 = arith.constant 0 : index
    %70 = memref.load %arg1[%c0_25, %c0_26] : memref<1x1xf32, #tpu.memory_space<smem>>
    memref.store %69, %arg1[%c0_25, %c0_26] : memref<1x1xf32, #tpu.memory_space<smem>>
    return
  }
}

</mosaic_0001>

<bundles_post_ra>
// kernel: tpu_custom_call.1
= control target key start
LH: loop header
LB: loop body
LE: loop exit
PB: predicated region body
PF: predicated region fallthrough
CT: control target
= control target key end

     0   :  { %6 = vsyncpa [#allocation3], 0  ;;  %s199_s0 = inlined_call_operand.hbm [shape: f32[32,80], index: 0, kind: input, shape index: {}]   ;;  %s200_s1 = inlined_call_operand.hbm [shape: f32[1,1], index: 1, kind: output, shape index: {}]  }
   0x1   :  { %7 = vsyncpa [#allocation4], 0  ;;  %s177_s6 = smov [#allocation2]  }
   0x2   :  { %s13_s7 = sshll.u32 %s177_s6, 4  ;;  %s14_s7 = int_to_ptr.vmem [resolvable:$true] %s13_s7 }
   0x3   :  { %s153_s8 = scalar_lea.vmem %s14_s7, 512  ;;  %p158_p1 = scmp.lt.s32.totalorder %s14_s7, %s14_s7 }
   0x4   :  { %p154_p0 = scmp.ne.s32.totalorder %s14_s7, %s153_s8  ;;  %p159_p2 = scmp.lt.s32.totalorder %s153_s8, %s153_s8 }
   0x6   :  { %p160_p3 = por %p159_p2, %p158_p1 }
   0x8   :  { %p161_p4 = pnand %p160_p3, %p154_p0 }
   0xa   :  { %164 = shalt.err (!%p161_p4)
}
   0xb   :  { %s178_s9 = smov 128   ;;  %s179_s10 = smov 8  }
   0xc   :  { %19 = dma.hbm_to_vmem [thread:$0]  %s199_s0, 512, %s14_s7, [#allocation3], %s178_s9, %s178_s9, %s179_s10  }
   0xd   :  { %173 = dma.done.wait [#allocation3], 512  }
   0xe   :  { %174 = vsyncadd [#allocation3], 4294966784  ;;  %v50_v0 = vlaneseq  ;;  %v23_v3 = vld [vmem:[#allocation2] sm:$0x1]  ;;  %v24_v4 = vld [vmem:[#allocation2 + $0x1] sm:$0x1] }
   0xf   :  { %v25_v5 = vld [vmem:[#allocation2 + $0x2] sm:$0x1]  ;;  %v26_v6 = vld [vmem:[#allocation2 + $0x3] sm:$0x1]  ;;  %v27_v7 = vld [vmem:[#allocation2 + $0x4] sm:$0x1] }
  0x10   :  { %v51_v1 = vshrl.u32 %v50_v0, 7  ;;  %v28_v8 = vld [vmem:[#allocation2 + $0x5] sm:$0x1]  ;;  %v34_v9 = vadd.f32 %v27_v7, %v23_v3  ;;  %v29_v11 = vld [vmem:[#allocation2 + $0x6] sm:$0x1]  ;;  %v31_v12 = vld [vmem:[#allocation2 + $0x8] sm:$0xff] }
  0x11   :  { %v35_v10 = vadd.f32 %v28_v8, %v24_v4  ;;  %v32_v13 = vld [vmem:[#allocation2 + $0x10] sm:$0xff]  ;;  %v33_v31 = vld [vmem:[#allocation2 + $0x18] sm:$0xff]  ;;  %vm79_vm0 = vcmask 654336   ;;  %v30_v62 = vld [vmem:[#allocation2 + $0x7] sm:$0x1]  ;;  %vm102_vm3 = vcmask 647168  }
  0x12   :  { %v52_v2 = vsub.s32 0, %v51_v1  ;;  %v36_v14 = vmul.f32 %v34_v9, %v25_v5  ;;  %v87_v33 = vsel %vm79_vm0, %v33_v31, 0.0  ;;  %vm68_vm1 = vcmp.lt.s32.totalorder %v51_v1, 5  ;;  %s180_s13 = smov [#allocation5]  }
  0x13   :  { %v37_v15 = vmul.f32 %v35_v10, %v26_v6  ;;  %v88_v34 = vrot.slane %v87_v33, 4 }
  0x14   :  { %v53_v16 = vrot.slane %v34_v9, %v52_v2  ;;  %v58_v17 = vrot.slane %v35_v10, %v52_v2  ;;  %v64_v21 = vrot.slane %v29_v11, %v52_v2 }
  0x15   :  { %v38_v18 = vadd.f32 %v37_v15, %v36_v14  ;;  %v89_v35 = vadd.f32 %v88_v34, %v87_v33 }
  0x16   :  { %v54_v19 = vmul.f32 %v53_v16, %v31_v12  ;;  %v59_v20 = vmul.f32 %v58_v17, %v32_v13 }
  0x17   :  { %v39_v22 = vadd.f32 %v38_v18, %v29_v11  ;;  %v90_v37 = vrot.slane %v89_v35, 2 }
  0x18   :  { %v60_v23 = vadd.f32 %v59_v20, %v54_v19 }
  0x19   :  { %v40_v24 = vsub.f32 0.0, %v39_v22  ;;  %v91_v40 = vadd.f32 %v90_v37, %v89_v35 }
  0x1a   :  { %v65_v25 = vadd.f32 %v64_v21, %v60_v23 }
  0x1b   :  { %v42_v26 = vand.u32 2147483647, %v40_v24  ;;  %v92_v42 = vrot.slane %v91_v40, 1  ;;  %v41_v54 = vmax.f32 %v40_v24, 0.0 }
  0x1c   :  { %v70_v27 = vand.u32 2147483647, %v65_v25  ;;  %v69_v44 = vmax.f32 %v65_v25, 0.0 }
  0x1d   :  { %v43_v29 = vsub.f32 0.0, %v42_v26  ;;  %v93_v43 = vadd.f32 %v92_v42, %v91_v40 }
  0x1e   :  { %v71_v28 = vsub.f32 0.0, %v70_v27 }
  0x1f   :  { %v44_v32 = vmul.f32 1.442695, %v43_v29  ;;  %v95_v46 = vmax.f32 %v93_v43, 1.0  ;;  %vm94_vm2 = vcmp.gt.f32.partialorder %v93_v43, 0.0 }
  0x20   :  { %v72_v30 = vmul.f32 1.442695, %v71_v28 }
  0x22   :  { %135 = vpow2.f32 %v72_v30 }
  0x23   :  { %137 = vpow2.f32 %v44_v32 }
  0x2f   :  { %v136_v36 = vpop.eup %135 }
  0x30   :  { %v74_v38 = vadd.f32 1.0, %v136_v36  ;;  %v138_v39 = vpop.eup %137 }
  0x31   :  { %v46_v41 = vadd.f32 1.0, %v138_v39 }
  0x32   :  { %139 = vlog2.f32 %v74_v38 }
  0x33   :  { %141 = vlog2.f32 %v46_v41 }
  0x34   :  { %143 = vrcp.f32 %v95_v46 }
  0x3f   :  { %v140_v45 = vpop.eup %139 }
  0x40   :  { %v76_v47 = vmul.f32 0.6931472, %v140_v45  ;;  %v142_v52 = vpop.eup %141 }
  0x41   :  { %v48_v55 = vmul.f32 0.6931472, %v142_v52  ;;  %v144_v60 = vpop.eup %143 }
  0x42   :  { %v77_v48 = vadd.f32 %v76_v47, %v69_v44  ;;  %v98_v0 = vsel %vm94_vm2, %v144_v60, 0.0 }
  0x43   :  { %v49_v58 = vadd.f32 %v48_v55, %v41_v54 }
  0x44   :  { %v78_v49 = vsel %vm68_vm1, %v77_v48, 0.0 }
  0x45   :  { %v80_v50 = vsel %vm79_vm0, %v78_v49, 0.0 }
  0x46   :  { %v81_v51 = vrot.slane %v80_v50, 4 }
  0x48   :  { %v82_v53 = vadd.f32 %v81_v51, %v80_v50 }
  0x4a   :  { %v83_v56 = vrot.slane %v82_v53, 2 }
  0x4c   :  { %v84_v57 = vadd.f32 %v83_v56, %v82_v53 }
  0x4e   :  { %v85_v59 = vrot.slane %v84_v57, 1 }
  0x50   :  { %v86_v61 = vadd.f32 %v85_v59, %v84_v57 }
  0x52   :  { %v99_v63 = vadd.f32 %v86_v61, %v49_v58 }
  0x54   :  { %v100_v1 = vmul.f32 %v99_v63, %v30_v62 }
  0x56   :  { %v101_v2 = vmul.f32 %v100_v1, %v98_v0 }
  0x58   :  { %v103_v3 = vsel %vm102_vm3, %v101_v2, 0.0 }
  0x59   :  { %104 = vadd.xlane.f32.xlu0 %v103_v3 }
  0xe2   :  { %v105_v4 = vpop.xlane.xlu0 %104 }
  0xe3   :  { %v106_v5 = vrot.slane %v105_v4, 4 }
  0xe5   :  { %v107_v6 = vadd.f32 %v106_v5, %v105_v4 }
  0xe7   :  { %v108_v7 = vrot.slane %v107_v6, 2 }
  0xe9   :  { %v109_v8 = vadd.f32 %v108_v7, %v107_v6 }
  0xeb   :  { %v110_v9 = vrot.slane %v109_v8, 1 }
  0xed   :  { %v111_v10 = vadd.f32 %v110_v9, %v109_v8 }
  0xef   :  { %129 = vpush %v111_v10 }
 0x120   :  { %s130_s0 = spop %129 }
 0x121   :  { %114 = sst [smem:[#allocation5]] %s130_s0 }
 0x122   :  { %122 = dma.smem_to_hbm %s180_s13, 16, %s200_s1, [#allocation4]  }
 0x123   :  { %175 = dma.done.wait [#allocation4], 16  }
 0x124   :  { %176 = vsyncadd [#allocation4], 4294967280 }
 0x125   :  { %126 = sfence }
 0x126   :  { %127 = vsyncpa [#allocation3], 1 }
 0x127   :  { %128 = vsyncpa [#allocation4], 1 }

</bundles_post_ra>
